<compile_context>
chip_gen: v5e
topology: v5e:2x2
jax: 0.10.0
libtpu: 0.0.40
codegen_flags: <defaults>
</compile_context>

<pallas_src>
import functools

import jax
import jax.numpy as jnp
from jax.experimental import pallas as pl
from jax.experimental.pallas import tpu as pltpu

HIDDEN = 256
HEAD_PAD = 128   # padded fused-head output width (lane-dense store)
TM_MAX = 512     # max batch-tile rows


def _round_up(x, m):
    return ((x + m - 1) // m) * m


def _choose_tile(batch):
    """Rows per grid step."""
    b8 = _round_up(batch, 8)
    if b8 <= 128:
        return b8                          # tiny batch: one small tile
    # >=2 roughly-equal tiles (both TensorCores on v7x via the "parallel"
    # axis, low pad waste for awkward sizes), capped at TM_MAX rows per tile.
    half = _round_up((b8 + 1) // 2, 8)
    return min(TM_MAX, half)


def actor_critic_kernel(
    x_ref,
    w1_ref, b1_ref,
    w2_ref, b2_ref,
    w3_ref, b3_ref,
    w4_ref, b4_ref,
    wh_ref, bh_ref,
    out_ref,
    *, action_dim,
):
    def dense_relu(h_bf16, w_ref, b_ref):
        # bf16 x bf16 MXU matmul, f32 accumulate; bias/ReLU in f32, cast back
        # to bf16 for the next MXU pass.
        y = jnp.dot(h_bf16, w_ref[...], preferred_element_type=jnp.float32)
        y = y + b_ref[...]
        return jnp.maximum(y, 0.0).astype(jnp.bfloat16)

    # common_layers: 4 x (Linear -> ReLU)
    h = x_ref[...].astype(jnp.bfloat16)        # [TM, state_dim]
    h = dense_relu(h, w1_ref, b1_ref)
    h = dense_relu(h, w2_ref, b2_ref)
    h = dense_relu(h, w3_ref, b3_ref)
    h = dense_relu(h, w4_ref, b4_ref)

    # fused actor+critic head: one [TM, HEAD_PAD] matmul.
    #   lanes [0, action_dim)   -> actor logits
    #   lane  action_dim        -> critic value
    #   lanes (action_dim, 128) -> zero padding
    head = jnp.dot(h, wh_ref[...], preferred_element_type=jnp.float32)
    head = head + bh_ref[...]

    lane = jax.lax.broadcasted_iota(jnp.int32, head.shape, 1)
    is_actor = lane < action_dim

    logits = jnp.where(is_actor, head, -jnp.inf)
    m = jnp.max(logits, axis=-1, keepdims=True)
    e = jnp.exp(logits - m)                    # padded lanes -> exp(-inf) = 0
    s = jnp.sum(e, axis=-1, keepdims=True)
    probs = e / s                              # exact normalization

    # lane-dense output slab: probs in actor lanes, raw critic value in its
    # lane, zeros elsewhere.
    out_ref[...] = jnp.where(lane == action_dim, head, probs)


def prepare_params(p, state_dim, action_dim):
    """Fuse / cast the logical params into the kernel layout (host, once)."""
    assert action_dim + 1 <= HEAD_PAD, "fused actor+critic head must fit in 128 lanes"

    def bf16(w):
        return w.astype(jnp.bfloat16)

    head_cols = action_dim + 1
    wh = jnp.concatenate([p["wa"], p["wc"]], axis=1)           # (HIDDEN, A+1)
    wh = jnp.pad(bf16(wh), ((0, 0), (0, HEAD_PAD - head_cols)))
    bh = jnp.concatenate([p["ba"], p["bc"]], axis=1)           # (1, A+1)
    bh = jnp.pad(bh, ((0, 0), (0, HEAD_PAD - head_cols)))

    return dict(
        w1=bf16(p["w1"]), b1=p["b1"],          # w1 stays (state_dim, HIDDEN)
        w2=bf16(p["w2"]), b2=p["b2"],
        w3=bf16(p["w3"]), b3=p["b3"],
        w4=bf16(p["w4"]), b4=p["b4"],
        wh=wh, bh=bh,
    )


def actor_critic_forward(x, kparams, action_dim):
    """x: [B, state_dim] f32 -> (action_probs [B, action_dim], value [B, 1])."""
    B, state_dim = x.shape

    tm = _choose_tile(B)
    b_pad = _round_up(B, tm)
    num_tiles = b_pad // tm

    # only the batch axis is padded; x keeps its narrow feature axis (the
    # short-K first matmul is handled by Mosaic and is <15% of total FLOPs).
    xp = jnp.pad(x, ((0, b_pad - B), (0, 0)))

    batch_in_spec = pl.BlockSpec((tm, state_dim), lambda i: (i, 0))
    out_spec = pl.BlockSpec((tm, HEAD_PAD), lambda i: (i, 0))

    def resident(shape):
        # weights/biases: same block for every grid step -> DMA'd once,
        # VMEM-resident across the whole batch grid.
        return pl.BlockSpec(shape, lambda i: (0, 0))

    # advisory cost estimate so XLA schedules the custom call sensibly.
    flops = 2 * b_pad * (state_dim * HIDDEN + 3 * HIDDEN * HIDDEN
                         + HIDDEN * HEAD_PAD)
    w_bytes = sum(int(v.size) * v.dtype.itemsize for v in kparams.values())
    bytes_accessed = (int(xp.size) * xp.dtype.itemsize + w_bytes
                      + b_pad * HEAD_PAD * 4)
    cost = pl.CostEstimate(flops=flops,
                           transcendentals=b_pad * HEAD_PAD,
                           bytes_accessed=bytes_accessed)

    out = pl.pallas_call(
        functools.partial(actor_critic_kernel, action_dim=action_dim),
        out_shape=jax.ShapeDtypeStruct((b_pad, HEAD_PAD), jnp.float32),
        grid=(num_tiles,),
        in_specs=[
            batch_in_spec,
            resident((state_dim, HIDDEN)), resident((1, HIDDEN)),
            resident((HIDDEN, HIDDEN)), resident((1, HIDDEN)),
            resident((HIDDEN, HIDDEN)), resident((1, HIDDEN)),
            resident((HIDDEN, HIDDEN)), resident((1, HIDDEN)),
            resident((HIDDEN, HEAD_PAD)), resident((1, HEAD_PAD)),
        ],
        out_specs=out_spec,
        compiler_params=pltpu.CompilerParams(
            dimension_semantics=("parallel",)),
        cost_estimate=cost,
    )(
        xp,
        kparams["w1"], kparams["b1"],
        kparams["w2"], kparams["b2"],
        kparams["w3"], kparams["b3"],
        kparams["w4"], kparams["b4"],
        kparams["wh"], kparams["bh"],
    )

    probs = out[:B, :action_dim]
    value = out[:B, action_dim:action_dim + 1]
    return probs, value


def init_params(key, state_dim, action_dim):
    """PyTorch nn.Linear default init (U[-1/sqrt(fan_in), 1/sqrt(fan_in)]).

    Weights are stored as (in_features, out_features), f32 (logical params).
    """
    def linear(key, fan_in, fan_out):
        kw, kb = jax.random.split(key)
        bound = 1.0 / jnp.sqrt(jnp.float32(fan_in))
        w = jax.random.uniform(kw, (fan_in, fan_out), jnp.float32, -bound, bound)
        b = jax.random.uniform(kb, (1, fan_out), jnp.float32, -bound, bound)
        return w, b

    keys = jax.random.split(key, 6)
    w1, b1 = linear(keys[0], state_dim, HIDDEN)
    w2, b2 = linear(keys[1], HIDDEN, HIDDEN)
    w3, b3 = linear(keys[2], HIDDEN, HIDDEN)
    w4, b4 = linear(keys[3], HIDDEN, HIDDEN)
    wa, ba = linear(keys[4], HIDDEN, action_dim)
    wc, bc = linear(keys[5], HIDDEN, 1)
    return dict(
        w1=w1, b1=b1, w2=w2, b2=b2, w3=w3, b3=b3, w4=w4, b4=b4,
        wa=wa, ba=ba, wc=wc, bc=bc,
    )


def reference_forward(x, p):
    """Pure-JAX reference mirroring the kernel math (bf16 MXU inputs, f32 acc)."""
    def dense_relu(h, w, b):
        y = jnp.dot(h.astype(jnp.bfloat16), w.astype(jnp.bfloat16),
                    preferred_element_type=jnp.float32) + b
        return jnp.maximum(y, 0.0)

    h = x
    for i in (1, 2, 3, 4):
        h = dense_relu(h, p[f"w{i}"], p[f"b{i}"])
        h = h.astype(jnp.bfloat16).astype(jnp.float32)
    hb = h.astype(jnp.bfloat16)
    logits = jnp.dot(hb, p["wa"].astype(jnp.bfloat16),
                     preferred_element_type=jnp.float32) + p["ba"]
    probs = jax.nn.softmax(logits, axis=-1)
    value = jnp.dot(hb, p["wc"].astype(jnp.bfloat16),
                    preferred_element_type=jnp.float32) + p["bc"]
    return probs, value


# TODO(synk): act()/evaluate_policy() (Categorical sample / log_prob / entropy)
# are distribution utilities outside forward(); not implemented as kernels.


if __name__ == "__main__":
    state_dim, action_dim = 8, 4

    key = jax.random.PRNGKey(0)
    kp, kdata = jax.random.split(key)
    params = init_params(kp, state_dim, action_dim)
    kparams = prepare_params(params, state_dim, action_dim)

    # B=2  : tiny batch -> one 8-row tile.
    # B=130: awkward size -> two 72-row tiles (multi-tile grid, low pad waste).
    # B=517: larger batch -> two ~264-row tiles (big-tile path).
    for i, B in enumerate((2, 130, 517)):
        kx = jax.random.fold_in(kdata, i)
        x = jax.random.normal(kx, (B, state_dim), jnp.float32)

        probs, value = actor_critic_forward(x, kparams, action_dim)
        jax.block_until_ready((probs, value))

        probs_ref, value_ref = reference_forward(x, params)
        assert probs.shape == (B, action_dim) and value.shape == (B, 1), B
        assert jnp.allclose(jnp.sum(probs, axis=-1), 1.0, atol=1e-3), B
        assert jnp.allclose(probs, probs_ref, atol=5e-3, rtol=5e-3), B
        assert jnp.allclose(value, value_ref, atol=5e-3, rtol=5e-3), B

    print("KERNEL_OK")
</pallas_src>

<mosaic_0001>
module attributes {stable_mosaic.version = 11 : i64} {
  func.func @actor_critic_kernel(%arg0: i32, %arg1: memref<8x8xf32, #tpu.memory_space<vmem>>, %arg2: memref<8x256xbf16, #tpu.memory_space<vmem>>, %arg3: memref<1x256xf32, #tpu.memory_space<vmem>>, %arg4: memref<256x256xbf16, #tpu.memory_space<vmem>>, %arg5: memref<1x256xf32, #tpu.memory_space<vmem>>, %arg6: memref<256x256xbf16, #tpu.memory_space<vmem>>, %arg7: memref<1x256xf32, #tpu.memory_space<vmem>>, %arg8: memref<256x256xbf16, #tpu.memory_space<vmem>>, %arg9: memref<1x256xf32, #tpu.memory_space<vmem>>, %arg10: memref<256x128xbf16, #tpu.memory_space<vmem>>, %arg11: memref<1x128xf32, #tpu.memory_space<vmem>>, %arg12: memref<8x128xf32, #tpu.memory_space<vmem>>) attributes {dimension_semantics = [#tpu.dimension_semantics<parallel>], iteration_bounds = array<i64: 1>, scalar_prefetch = 0 : i64, scratch_operands = 0 : i64, tpu.core_type = #tpu.core_type<tc>, window_params = [{transform_indices = @transform_0, window_bounds = array<i64: 8, 8>}, {pipeline_mode = #tpu.pipeline_mode<synchronous>, transform_indices = @transform_1, window_bounds = array<i64: 8, 256>}, {pipeline_mode = #tpu.pipeline_mode<synchronous>, transform_indices = @transform_2, window_bounds = array<i64: 1, 256>}, {pipeline_mode = #tpu.pipeline_mode<synchronous>, transform_indices = @transform_3, window_bounds = array<i64: 256, 256>}, {pipeline_mode = #tpu.pipeline_mode<synchronous>, transform_indices = @transform_4, window_bounds = array<i64: 1, 256>}, {pipeline_mode = #tpu.pipeline_mode<synchronous>, transform_indices = @transform_5, window_bounds = array<i64: 256, 256>}, {pipeline_mode = #tpu.pipeline_mode<synchronous>, transform_indices = @transform_6, window_bounds = array<i64: 1, 256>}, {pipeline_mode = #tpu.pipeline_mode<synchronous>, transform_indices = @transform_7, window_bounds = array<i64: 256, 256>}, {pipeline_mode = #tpu.pipeline_mode<synchronous>, transform_indices = @transform_8, window_bounds = array<i64: 1, 256>}, {pipeline_mode = #tpu.pipeline_mode<synchronous>, transform_indices = @transform_9, window_bounds = array<i64: 256, 128>}, {pipeline_mode = #tpu.pipeline_mode<synchronous>, transform_indices = @transform_10, window_bounds = array<i64: 1, 128>}, {transform_indices = @transform_11, window_bounds = array<i64: 8, 128>}]} {
    %c0 = arith.constant 0 : index
    %c0_0 = arith.constant 0 : index
    %0 = vector.load %arg1[%c0, %c0_0] : memref<8x8xf32, #tpu.memory_space<vmem>>, vector<8x8xf32>
    %1 = arith.truncf %0 : vector<8x8xf32> to vector<8x8xbf16>
    %c0_1 = arith.constant 0 : index
    %c0_2 = arith.constant 0 : index
    %2 = vector.load %arg2[%c0_1, %c0_2] : memref<8x256xbf16, #tpu.memory_space<vmem>>, vector<8x256xbf16>
    %cst = arith.constant dense<0.000000e+00> : vector<8x256xf32>
    %3 = tpu.matmul %1, %2, %cst {dimension_numbers = #tpu.dot_dimension_numbers<[1], [0], [0], [1], [0, 0, 1, 1], [], []>} : vector<8x8xbf16>, vector<8x256xbf16>, vector<8x256xf32> -> vector<8x256xf32>
    %c0_3 = arith.constant 0 : index
    %c0_4 = arith.constant 0 : index
    %4 = vector.load %arg3[%c0_3, %c0_4] : memref<1x256xf32, #tpu.memory_space<vmem>>, vector<1x256xf32>
    %5 = vector.broadcast %4 : vector<1x256xf32> to vector<8x256xf32>
    %6 = arith.addf %3, %5 : vector<8x256xf32>
    %cst_5 = arith.constant 0.000000e+00 : f32
    %7 = vector.broadcast %cst_5 : f32 to vector<8x256xf32>
    %8 = arith.maximumf %6, %7 : vector<8x256xf32>
    %9 = arith.truncf %8 : vector<8x256xf32> to vector<8x256xbf16>
    %c0_6 = arith.constant 0 : index
    %c0_7 = arith.constant 0 : index
    %10 = vector.load %arg4[%c0_6, %c0_7] : memref<256x256xbf16, #tpu.memory_space<vmem>>, vector<256x256xbf16>
    %cst_8 = arith.constant dense<0.000000e+00> : vector<8x256xf32>
    %11 = tpu.matmul %9, %10, %cst_8 {dimension_numbers = #tpu.dot_dimension_numbers<[1], [0], [0], [1], [0, 0, 1, 1], [], []>} : vector<8x256xbf16>, vector<256x256xbf16>, vector<8x256xf32> -> vector<8x256xf32>
    %c0_9 = arith.constant 0 : index
    %c0_10 = arith.constant 0 : index
    %12 = vector.load %arg5[%c0_9, %c0_10] : memref<1x256xf32, #tpu.memory_space<vmem>>, vector<1x256xf32>
    %13 = vector.broadcast %12 : vector<1x256xf32> to vector<8x256xf32>
    %14 = arith.addf %11, %13 : vector<8x256xf32>
    %cst_11 = arith.constant 0.000000e+00 : f32
    %15 = vector.broadcast %cst_11 : f32 to vector<8x256xf32>
    %16 = arith.maximumf %14, %15 : vector<8x256xf32>
    %17 = arith.truncf %16 : vector<8x256xf32> to vector<8x256xbf16>
    %c0_12 = arith.constant 0 : index
    %c0_13 = arith.constant 0 : index
    %18 = vector.load %arg6[%c0_12, %c0_13] : memref<256x256xbf16, #tpu.memory_space<vmem>>, vector<256x256xbf16>
    %cst_14 = arith.constant dense<0.000000e+00> : vector<8x256xf32>
    %19 = tpu.matmul %17, %18, %cst_14 {dimension_numbers = #tpu.dot_dimension_numbers<[1], [0], [0], [1], [0, 0, 1, 1], [], []>} : vector<8x256xbf16>, vector<256x256xbf16>, vector<8x256xf32> -> vector<8x256xf32>
    %c0_15 = arith.constant 0 : index
    %c0_16 = arith.constant 0 : index
    %20 = vector.load %arg7[%c0_15, %c0_16] : memref<1x256xf32, #tpu.memory_space<vmem>>, vector<1x256xf32>
    %21 = vector.broadcast %20 : vector<1x256xf32> to vector<8x256xf32>
    %22 = arith.addf %19, %21 : vector<8x256xf32>
    %cst_17 = arith.constant 0.000000e+00 : f32
    %23 = vector.broadcast %cst_17 : f32 to vector<8x256xf32>
    %24 = arith.maximumf %22, %23 : vector<8x256xf32>
    %25 = arith.truncf %24 : vector<8x256xf32> to vector<8x256xbf16>
    %c0_18 = arith.constant 0 : index
    %c0_19 = arith.constant 0 : index
    %26 = vector.load %arg8[%c0_18, %c0_19] : memref<256x256xbf16, #tpu.memory_space<vmem>>, vector<256x256xbf16>
    %cst_20 = arith.constant dense<0.000000e+00> : vector<8x256xf32>
    %27 = tpu.matmul %25, %26, %cst_20 {dimension_numbers = #tpu.dot_dimension_numbers<[1], [0], [0], [1], [0, 0, 1, 1], [], []>} : vector<8x256xbf16>, vector<256x256xbf16>, vector<8x256xf32> -> vector<8x256xf32>
    %c0_21 = arith.constant 0 : index
    %c0_22 = arith.constant 0 : index
    %28 = vector.load %arg9[%c0_21, %c0_22] : memref<1x256xf32, #tpu.memory_space<vmem>>, vector<1x256xf32>
    %29 = vector.broadcast %28 : vector<1x256xf32> to vector<8x256xf32>
    %30 = arith.addf %27, %29 : vector<8x256xf32>
    %cst_23 = arith.constant 0.000000e+00 : f32
    %31 = vector.broadcast %cst_23 : f32 to vector<8x256xf32>
    %32 = arith.maximumf %30, %31 : vector<8x256xf32>
    %33 = arith.truncf %32 : vector<8x256xf32> to vector<8x256xbf16>
    %c0_24 = arith.constant 0 : index
    %c0_25 = arith.constant 0 : index
    %34 = vector.load %arg10[%c0_24, %c0_25] : memref<256x128xbf16, #tpu.memory_space<vmem>>, vector<256x128xbf16>
    %cst_26 = arith.constant dense<0.000000e+00> : vector<8x128xf32>
    %35 = tpu.matmul %33, %34, %cst_26 {dimension_numbers = #tpu.dot_dimension_numbers<[1], [0], [0], [1], [0, 0, 1, 1], [], []>} : vector<8x256xbf16>, vector<256x128xbf16>, vector<8x128xf32> -> vector<8x128xf32>
    %c0_27 = arith.constant 0 : index
    %c0_28 = arith.constant 0 : index
    %36 = vector.load %arg11[%c0_27, %c0_28] : memref<1x128xf32, #tpu.memory_space<vmem>>, vector<1x128xf32>
    %37 = vector.broadcast %36 : vector<1x128xf32> to vector<8x128xf32>
    %38 = arith.addf %35, %37 : vector<8x128xf32>
    %39 = tpu.iota {dimensions = array<i32: 1>} : vector<8x128xi32>
    %c4_i32 = arith.constant 4 : i32
    %40 = vector.broadcast %c4_i32 : i32 to vector<8x128xi32>
    %41 = arith.cmpi slt, %39, %40 : vector<8x128xi32>
    %cst_29 = arith.constant 0xFF800000 : f32
    %42 = vector.broadcast %cst_29 : f32 to vector<8x128xf32>
    %43 = arith.select %41, %38, %42 : vector<8x128xi1>, vector<8x128xf32>
    %cst_30 = arith.constant dense<0xFF800000> : vector<8xf32>
    %44 = vector.multi_reduction <maximumf>, %43, %cst_30 [1] : vector<8x128xf32> to vector<8xf32>
    %45 = vector.shape_cast %44 : vector<8xf32> to vector<8x1xf32>
    %46 = vector.broadcast %45 : vector<8x1xf32> to vector<8x128xf32>
    %47 = arith.subf %43, %46 : vector<8x128xf32>
    %48 = math.exp %47 : vector<8x128xf32>
    %cst_31 = arith.constant dense<0.000000e+00> : vector<8xf32>
    %49 = vector.multi_reduction <add>, %48, %cst_31 [1] : vector<8x128xf32> to vector<8xf32>
    %50 = vector.shape_cast %49 : vector<8xf32> to vector<8x1xf32>
    %51 = vector.broadcast %50 : vector<8x1xf32> to vector<8x128xf32>
    %52 = arith.divf %48, %51 : vector<8x128xf32>
    %c4_i32_32 = arith.constant 4 : i32
    %53 = vector.broadcast %c4_i32_32 : i32 to vector<8x128xi32>
    %54 = arith.cmpi eq, %39, %53 : vector<8x128xi32>
    %55 = arith.select %54, %38, %52 : vector<8x128xi1>, vector<8x128xf32>
    %c0_33 = arith.constant 0 : index
    %c0_34 = arith.constant 0 : index
    %56 = vector.load %arg12[%c0_33, %c0_34] : memref<8x128xf32, #tpu.memory_space<vmem>>, vector<8x128xf32>
    tpu.vector_store %arg12[%c0_33, %c0_34], %55 {strides = array<i32>} : memref<8x128xf32, #tpu.memory_space<vmem>>, vector<8x128xf32>,
    return
  }
  func.func @transform_0(%arg0: i32) -> (i32, i32) {
    %c0_i32 = arith.constant 0 : i32
    %c0_i32_0 = arith.constant 0 : i32
    return %arg0, %c0_i32 : i32, i32
  }
  func.func @transform_1(%arg0: i32) -> (i32, i32) {
    %c0_i32 = arith.constant 0 : i32
    %c0_i32_0 = arith.constant 0 : i32
    %c0_i32_1 = arith.constant 0 : i32
    return %c0_i32, %c0_i32_0 : i32, i32
  }
  func.func @transform_2(%arg0: i32) -> (i32, i32) {
    %c0_i32 = arith.constant 0 : i32
    %c0_i32_0 = arith.constant 0 : i32
    %c0_i32_1 = arith.constant 0 : i32
    return %c0_i32, %c0_i32_0 : i32, i32
  }
  func.func @transform_3(%arg0: i32) -> (i32, i32) {
    %c0_i32 = arith.constant 0 : i32
    %c0_i32_0 = arith.constant 0 : i32
    %c0_i32_1 = arith.constant 0 : i32
    return %c0_i32, %c0_i32_0 : i32, i32
  }
  func.func @transform_4(%arg0: i32) -> (i32, i32) {
    %c0_i32 = arith.constant 0 : i32
    %c0_i32_0 = arith.constant 0 : i32
    %c0_i32_1 = arith.constant 0 : i32
    return %c0_i32, %c0_i32_0 : i32, i32
  }
  func.func @transform_5(%arg0: i32) -> (i32, i32) {
    %c0_i32 = arith.constant 0 : i32
    %c0_i32_0 = arith.constant 0 : i32
    %c0_i32_1 = arith.constant 0 : i32
    return %c0_i32, %c0_i32_0 : i32, i32
  }
  func.func @transform_6(%arg0: i32) -> (i32, i32) {
    %c0_i32 = arith.constant 0 : i32
    %c0_i32_0 = arith.constant 0 : i32
    %c0_i32_1 = arith.constant 0 : i32
    return %c0_i32, %c0_i32_0 : i32, i32
  }
  func.func @transform_7(%arg0: i32) -> (i32, i32) {
    %c0_i32 = arith.constant 0 : i32
    %c0_i32_0 = arith.constant 0 : i32
    %c0_i32_1 = arith.constant 0 : i32
    return %c0_i32, %c0_i32_0 : i32, i32
  }
  func.func @transform_8(%arg0: i32) -> (i32, i32) {
    %c0_i32 = arith.constant 0 : i32
    %c0_i32_0 = arith.constant 0 : i32
    %c0_i32_1 = arith.constant 0 : i32
    return %c0_i32, %c0_i32_0 : i32, i32
  }
  func.func @transform_9(%arg0: i32) -> (i32, i32) {
    %c0_i32 = arith.constant 0 : i32
    %c0_i32_0 = arith.constant 0 : i32
    %c0_i32_1 = arith.constant 0 : i32
    return %c0_i32, %c0_i32_0 : i32, i32
  }
  func.func @transform_10(%arg0: i32) -> (i32, i32) {
    %c0_i32 = arith.constant 0 : i32
    %c0_i32_0 = arith.constant 0 : i32
    %c0_i32_1 = arith.constant 0 : i32
    return %c0_i32, %c0_i32_0 : i32, i32
  }
  func.func @transform_11(%arg0: i32) -> (i32, i32) {
    %c0_i32 = arith.constant 0 : i32
    %c0_i32_0 = arith.constant 0 : i32
    return %arg0, %c0_i32 : i32, i32
  }
}

</mosaic_0001>

<bundles_post_ra>
// kernel: tpu_custom_call.1
= control target key start
LH: loop header
LB: loop body
LE: loop exit
PB: predicated region body
PF: predicated region fallthrough
CT: control target
= control target key end

     0   :  { %16 = vsyncpa [#allocation3], 0  ;;  %s2069_s0 = inlined_call_operand.hbm [shape: f32[8,8], index: 0, kind: input, shape index: {}]   ;;  %s2070_s1 = inlined_call_operand.hbm [shape: bf16[8,256], index: 1, kind: input, shape index: {}]   ;;  %s2071_s2 = inlined_call_operand.hbm [shape: f32[1,256], index: 2, kind: input, shape index: {}]   ;;  %s2072_s3 = inlined_call_operand.hbm [shape: bf16[256,256], index: 3, kind: input, shape index: {}]   ;;  %s2073_s4 = inlined_call_operand.vmem [shape: f32[1,256], index: 4, kind: input, shape index: {}]   ;;  %s2074_s5 = inlined_call_operand.hbm [shape: bf16[256,256], index: 5, kind: input, shape index: {}]   ;;  %s2075_s6 = inlined_call_operand.vmem [shape: f32[1,256], index: 6, kind: input, shape index: {}]   ;;  %s2076_s7 = inlined_call_operand.hbm [shape: bf16[256,256], index: 7, kind: input, shape index: {}]   ;;  %s2077_s8 = inlined_call_operand.vmem [shape: f32[1,256], index: 8, kind: input, shape index: {}]   ;;  %s2078_s9 = inlined_call_operand.hbm [shape: bf16[256,128], index: 9, kind: input, shape index: {}]   ;;  %s2079_s10 = inlined_call_operand.vmem [shape: f32[1,128], index: 10, kind: input, shape index: {}]   ;;  %s2080_s11 = inlined_call_operand.hbm [shape: f32[8,128], index: 11, kind: output, shape index: {}]  }
   0x1   :  { %17 = vsyncpa [#allocation6], 0 }
   0x2   :  { %18 = vsyncpa [#allocation9], 0 }
   0x3   :  { %19 = vsyncpa [#allocation12], 0  ;;  %s37_s19 = sshll.u32 %s2070_s1, 4  ;;  %s38_s19 = int_to_ptr.hbm [resolvable:$true] %s37_s19 }
   0x4   :  { %20 = vsyncpa [#allocation4], 0  ;;  %s1948_s20 = smov [#allocation5]   ;;  %s58_s24 = sshll.u32 %s2072_s3, 4  ;;  %s59_s24 = int_to_ptr.hbm [resolvable:$true] %s58_s24 }
   0x5   :  { %s39_s21 = sshll.u32 %s1948_s20, 4  ;;  %s1949_s25 = smov [#allocation8]   ;;  %s40_s21 = int_to_ptr.vmem [resolvable:$true] %s39_s21 }
   0x6   :  { %42 = dma.hbm_to_vmem [thread:$0]  %s38_s19, 128, %s40_s21, [#allocation6]  }
   0x7   :  { %s60_s26 = sshll.u32 %s1949_s25, 4  ;;  %s1950_s27 = smov 128   ;;  %s61_s26 = int_to_ptr.vmem [resolvable:$true] %s60_s26 }
   0x8   :  { %s1951_s28 = smov 8   ;;  %s88_s30 = sshll.u32 %s2076_s7, 4  ;;  %s89_s30 = int_to_ptr.hbm [resolvable:$true] %s88_s30 }
   0x9   :  { %66 = dma.hbm_to_vmem [thread:$0]  %s59_s24, 4096, %s61_s26, [#allocation9], %s1950_s27, %s1950_s27, %s1951_s28  }
   0xa   :  { %s1952_s12 = smov [#allocation11]   ;;  %s26_s15 = sshll.u32 %s2069_s0, 4  ;;  %s27_s15 = int_to_ptr.hbm [resolvable:$true] %s26_s15 }
   0xb   :  { %s90_s13 = sshll.u32 %s1952_s12, 4  ;;  %s1953_s16 = smov [#allocation2]   ;;  %s91_s13 = int_to_ptr.vmem [resolvable:$true] %s90_s13 }
   0xc   :  { %96 = dma.hbm_to_vmem [thread:$0]  %s89_s30, 4096, %s91_s13, [#allocation12], %s1950_s27, %s1950_s27, %s1951_s28  }
   0xd   :  { %s28_s17 = sshll.u32 %s1953_s16, 4  ;;  %s48_s20 = sshll.u32 %s2071_s2, 4  ;;  %s29_s17 = int_to_ptr.vmem [resolvable:$true] %s28_s17  ;;  %s49_s20 = int_to_ptr.hbm [resolvable:$true] %s48_s20 }
   0xe   :  { %31 = dma.hbm_to_vmem [thread:$0]  %s27_s15, 128, %s29_s17, [#allocation3]  }
   0xf   :  { %s73_s22 = sshll.u32 %s2074_s5, 4  ;;  %s1954_s23 = smov [#allocation7]   ;;  %s74_s22 = int_to_ptr.hbm [resolvable:$true] %s73_s22 }
  0x10   :  { %s50_s0 = sshll.u32 %s1954_s23, 4  ;;  %s1955_s24 = smov [#allocation10]   ;;  %s51_s0 = int_to_ptr.vmem [resolvable:$true] %s50_s0 }
  0x11   :  { %53 = dma.hbm_to_vmem [thread:$0]  %s49_s20, 32, %s51_s0, [#allocation6]  }
  0x12   :  { %s75_s25 = sshll.u32 %s1955_s24, 4  ;;  %s103_s29 = sshll.u32 %s2078_s9, 4  ;;  %s76_s25 = int_to_ptr.vmem [resolvable:$true] %s75_s25  ;;  %s104_s29 = int_to_ptr.hbm [resolvable:$true] %s103_s29 }
  0x13   :  { %81 = dma.hbm_to_vmem [thread:$0]  %s74_s22, 4096, %s76_s25, [#allocation9], %s1950_s27, %s1950_s27, %s1951_s28  }
  0x14   :  { %s1956_s2 = smov [#allocation13]   ;;  %s1957_s5 = smov 64  }
  0x15   :  { %s105_s30 = sshll.u32 %s1956_s2, 4  ;;  %s1958_s12 = smov 4   ;;  %s106_s30 = int_to_ptr.vmem [resolvable:$true] %s105_s30 }
  0x16   :  { %111 = dma.hbm_to_vmem [thread:$0]  %s104_s29, 2048, %s106_s30, [#allocation12], %s1957_s5, %s1957_s5, %s1958_s12  }
  0x17   :  { %1938 = dma.done.wait [#allocation3], 128  }
  0x18   :  { %1939 = vsyncadd [#allocation3], 4294967168 }
  0x19   :  { %1940 = dma.done.wait [#allocation6], 160  }
  0x1a   :  { %1941 = vsyncadd [#allocation6], 4294967136 }
  0x1b   :  { %1942 = dma.done.wait [#allocation9], 8192  }
  0x1c   :  { %1943 = vsyncadd [#allocation9], 4294959104 }
  0x1d   :  { %1944 = dma.done.wait [#allocation12], 6144  }
  0x1e   :  { %1945 = vsyncadd [#allocation12], 4294961152  ;;  %v145_v0 = vld [vmem:[#allocation5] sm:$0xff]  ;;  %vm161_vm0 = vcmask 1043456   ;;  %v143_v1 = vld [vmem:[#allocation2] sm:$0xff]  ;;  %vm157_vm1 = vcmask 64512  }
  0x1f   :  { %v1227_v2 = vld [vmem:[#allocation8 + $0x70] sm:$0xf]  ;;  %v153_v3 = vunpack.c.l.b16 %v145_v0  ;;  %v154_v4 = vunpack.c.h.b16 %v145_v0  ;;  %v1632_v5 = vld [vmem:[#allocation8 + $0x74] sm:$0xf0]  ;;  %v1631_v10 = vld [vmem:[#allocation8 + $0x74] sm:$0xf]  ;;  %v144_v26 = vpack.c.bf16 %v143_v1, %v143_v1 }
  0x20   :  { %v1291_v6 = vld [vmem:[#allocation8 + $0xf0] sm:$0xf]  ;;  %v1648_v7 = vld [vmem:[#allocation8 + $0xf4] sm:$0xf0]  ;;  %v1228_v8 = vor.u32 %v1632_v5, %v1227_v2  ;;  %v1229_v11 = vld [vmem:[#allocation8 + $0x78] sm:$0xf0] }
  0x21   :  { %v1292_v9 = vor.u32 %v1648_v7, %v1291_v6  ;;  %v1647_v12 = vld [vmem:[#allocation8 + $0xf4] sm:$0xf]  ;;  %v155_v13 = vpack.c.b16 %v153_v3, %v153_v3  ;;  %v156_v14 = vpack.c.b16 %v154_v4, %v154_v4  ;;  %v1232_v15 = vor.u32 %v1631_v10, %v1229_v11  ;;  %v1293_v16 = vld [vmem:[#allocation8 + $0xf8] sm:$0xf0]  ;;  %v1219_v17 = vld [vmem:[#allocation8 + $0x60] sm:$0xf] }
  0x22   :  { %v1630_v18 = vld [vmem:[#allocation8 + $0x64] sm:$0xf0]  ;;  %396 = vmatpush.bf16.msra.mxu2 %v1228_v8  ;;  %v1296_v19 = vor.u32 %v1647_v12, %v1293_v16  ;;  %v1283_v21 = vld [vmem:[#allocation8 + $0xe0] sm:$0xf]  ;;  %v1629_v23 = vld [vmem:[#allocation8 + $0x64] sm:$0xf] }
  0x23   :  { %409 = vmatpush.bf16.msra.mxu3 %v1292_v9  ;;  %v1220_v20 = vor.u32 %v1630_v18, %v1219_v17  ;;  %v1646_v22 = vld [vmem:[#allocation8 + $0xe4] sm:$0xf0]  ;;  %v163_v24 = vsel %vm161_vm0, %v155_v13, 0  ;;  %v166_v25 = vsel %vm161_vm0, %v156_v14, 0  ;;  %v1221_v28 = vld [vmem:[#allocation8 + $0x68] sm:$0xf0] }
  0x24   :  { %v1284_v27 = vor.u32 %v1646_v22, %v1283_v21  ;;  %v1645_v29 = vld [vmem:[#allocation8 + $0xe4] sm:$0xf]  ;;  %175 = vmatpush.bf16.msra.mxu0 %v163_v24  ;;  %188 = vmatpush.bf16.msra.mxu1 %v166_v25  ;;  %v1285_v30 = vld [vmem:[#allocation8 + $0xe8] sm:$0xf0]  ;;  %v1211_v31 = vld [vmem:[#allocation8 + $0x50] sm:$0xf]  ;;  %v1224_v33 = vor.u32 %v1629_v23, %v1221_v28 }
  0x25   :  { %v1628_v32 = vld [vmem:[#allocation8 + $0x54] sm:$0xf0]  ;;  %v1288_v34 = vor.u32 %v1645_v29, %v1285_v30  ;;  %v1275_v35 = vld [vmem:[#allocation8 + $0xd0] sm:$0xf]  ;;  %v1627_v37 = vld [vmem:[#allocation8 + $0x54] sm:$0xf] }
  0x26   :  { %v1644_v36 = vld [vmem:[#allocation8 + $0xd4] sm:$0xf0]  ;;  %397 = vmatpush.bf16.msra.mxu2 %v1220_v20  ;;  %v1212_v38 = vor.u32 %v1628_v32, %v1211_v31  ;;  %v1213_v40 = vld [vmem:[#allocation8 + $0x58] sm:$0xf0]  ;;  %v1643_v41 = vld [vmem:[#allocation8 + $0xd4] sm:$0xf] }
  0x27   :  { %410 = vmatpush.bf16.msra.mxu3 %v1284_v27  ;;  %v1276_v39 = vor.u32 %v1644_v36, %v1275_v35  ;;  %v1277_v42 = vld [vmem:[#allocation8 + $0xd8] sm:$0xf0]  ;;  %1167 = vmatmul.msk.bf16.vlgmr.msra.gmra.mxu0 %vm157_vm1, %v144_v26  ;;  %v1203_v43 = vld [vmem:[#allocation8 + $0x40] sm:$0xf]  ;;  %v1626_v44 = vld [vmem:[#allocation8 + $0x44] sm:$0xf0]  ;;  %v1216_v47 = vor.u32 %v1627_v37, %v1213_v40 }
  0x28   :  { %422 = vmatpush.bf16.msrb.mxu0 %v1232_v15  ;;  %435 = vmatpush.bf16.msrb.mxu1 %v1296_v19  ;;  %v1267_v45 = vld [vmem:[#allocation8 + $0xc0] sm:$0xf]  ;;  %v1642_v46 = vld [vmem:[#allocation8 + $0xc4] sm:$0xf0]  ;;  %v1280_v48 = vor.u32 %v1643_v41, %v1277_v42  ;;  %v1625_v49 = vld [vmem:[#allocation8 + $0x44] sm:$0xf]  ;;  %v1204_v51 = vor.u32 %v1626_v44, %v1203_v43 }
  0x29   :  { %1168 = vmatmul.msk.bf16.vlgmr.msra.gmra.mxu1 %vm157_vm1, %v144_v26  ;;  %v1205_v50 = vld [vmem:[#allocation8 + $0x48] sm:$0xf0]  ;;  %v1268_v52 = vor.u32 %v1642_v46, %v1267_v45  ;;  %v1641_v53 = vld [vmem:[#allocation8 + $0xc4] sm:$0xf]  ;;  %v1195_v55 = vld [vmem:[#allocation8 + $0x30] sm:$0xf] }
  0x2a   :  { %398 = vmatpush.bf16.msra.mxu2 %v1212_v38  ;;  %v1269_v54 = vld [vmem:[#allocation8 + $0xc8] sm:$0xf0]  ;;  %v1624_v56 = vld [vmem:[#allocation8 + $0x34] sm:$0xf0]  ;;  %v1259_v57 = vld [vmem:[#allocation8 + $0xb0] sm:$0xf]  ;;  %v1208_v59 = vor.u32 %v1625_v49, %v1205_v50 }
  0x2b   :  { %411 = vmatpush.bf16.msra.mxu3 %v1276_v39  ;;  %v1640_v58 = vld [vmem:[#allocation8 + $0xb4] sm:$0xf0]  ;;  %v1272_v60 = vor.u32 %v1641_v53, %v1269_v54  ;;  %v1623_v61 = vld [vmem:[#allocation8 + $0x34] sm:$0xf]  ;;  %v1197_v62 = vld [vmem:[#allocation8 + $0x38] sm:$0xf0]  ;;  %v1196_v0 = vor.u32 %v1624_v56, %v1195_v55 }
  0x2c   :  { %423 = vmatpush.bf16.msrb.mxu0 %v1224_v33  ;;  %436 = vmatpush.bf16.msrb.mxu1 %v1288_v34  ;;  %v1639_v63 = vld [vmem:[#allocation8 + $0xb4] sm:$0xf]  ;;  %v1260_v1 = vor.u32 %v1640_v58, %v1259_v57  ;;  %v1261_v2 = vld [vmem:[#allocation8 + $0xb8] sm:$0xf0]  ;;  %v1187_v3 = vld [vmem:[#allocation8 + $0x20] sm:$0xf]  ;;  %v1200_v7 = vor.u32 %v1623_v61, %v1197_v62 }
  0x2d   :  { %v1622_v4 = vld [vmem:[#allocation8 + $0x24] sm:$0xf0]  ;;  %v1251_v5 = vld [vmem:[#allocation8 + $0xa0] sm:$0xf]  ;;  %v1264_v8 = vor.u32 %v1639_v63, %v1261_v2  ;;  %v1621_v9 = vld [vmem:[#allocation8 + $0x24] sm:$0xf] }
  0x2e   :  { %399 = vmatpush.bf16.msra.mxu2 %v1204_v51  ;;  %v1638_v6 = vld [vmem:[#allocation8 + $0xa4] sm:$0xf0]  ;;  %v1188_v10 = vor.u32 %v1622_v4, %v1187_v3  ;;  %v1189_v12 = vld [vmem:[#allocation8 + $0x28] sm:$0xf0]  ;;  %v1637_v13 = vld [vmem:[#allocation8 + $0xa4] sm:$0xf] }
  0x2f   :  { %412 = vmatpush.bf16.msra.mxu3 %v1268_v52  ;;  %v1252_v11 = vor.u32 %v1638_v6, %v1251_v5  ;;  %v1253_v14 = vld [vmem:[#allocation8 + $0xa8] sm:$0xf0]  ;;  %v1192_v15 = vor.u32 %v1621_v9, %v1189_v12  ;;  %v1179_v17 = vld [vmem:[#allocation8 + $0x10] sm:$0xf]  ;;  %v1620_v18 = vld [vmem:[#allocation8 + $0x14] sm:$0xf0] }
  0x30   :  { %424 = vmatpush.bf16.msrb.mxu0 %v1216_v47  ;;  %437 = vmatpush.bf16.msrb.mxu1 %v1280_v48  ;;  %v1256_v16 = vor.u32 %v1637_v13, %v1253_v14  ;;  %v1243_v19 = vld [vmem:[#allocation8 + $0x90] sm:$0xf]  ;;  %v1180_v20 = vor.u32 %v1620_v18, %v1179_v17  ;;  %v1636_v21 = vld [vmem:[#allocation8 + $0x94] sm:$0xf0]  ;;  %v1619_v22 = vld [vmem:[#allocation8 + $0x14] sm:$0xf] }
  0x31   :  { %v1181_v23 = vld [vmem:[#allocation8 + $0x18] sm:$0xf0]  ;;  %v1244_v24 = vor.u32 %v1636_v21, %v1243_v19  ;;  %v1635_v26 = vld [vmem:[#allocation8 + $0x94] sm:$0xf]  ;;  %v1171_v29 = vld [vmem:[#allocation8] sm:$0xf] }
  0x32   :  { %400 = vmatpush.bf16.msra.mxu2 %v1196_v0  ;;  %v1184_v25 = vor.u32 %v1619_v22, %v1181_v23  ;;  %v1245_v27 = vld [vmem:[#allocation8 + $0x98] sm:$0xf0]  ;;  %v1618_v30 = vld [vmem:[#allocation8 + $0x4] sm:$0xf0]  ;;  %v1235_v31 = vld [vmem:[#allocation8 + $0x80] sm:$0xf] }
  0x33   :  { %413 = vmatpush.bf16.msra.mxu3 %v1260_v1  ;;  %v1248_v28 = vor.u32 %v1635_v26, %v1245_v27  ;;  %v1172_v32 = vor.u32 %v1618_v30, %v1171_v29  ;;  %v1634_v33 = vld [vmem:[#allocation8 + $0x84] sm:$0xf0]  ;;  %v1617_v34 = vld [vmem:[#allocation8 + $0x4] sm:$0xf]  ;;  %v1173_v35 = vld [vmem:[#allocation8 + $0x8] sm:$0xf0] }
  0x34   :  { %425 = vmatpush.bf16.msrb.mxu0 %v1208_v59  ;;  %438 = vmatpush.bf16.msrb.mxu1 %v1272_v60  ;;  %v1236_v36 = vor.u32 %v1634_v33, %v1235_v31  ;;  %v1176_v37 = vor.u32 %v1617_v34, %v1173_v35  ;;  %v1633_v38 = vld [vmem:[#allocation8 + $0x84] sm:$0xf]  ;;  %v1237_v39 = vld [vmem:[#allocation8 + $0x88] sm:$0xf0]  ;;  %v1419_v41 = vld [vmem:[#allocation10 + $0xf0] sm:$0xf] }
  0x35   :  { %v1240_v40 = vor.u32 %v1633_v38, %v1237_v39  ;;  %v1680_v42 = vld [vmem:[#allocation10 + $0xf4] sm:$0xf0]  ;;  %v1679_v43 = vld [vmem:[#allocation10 + $0xf4] sm:$0xf]  ;;  %v1421_v45 = vld [vmem:[#allocation10 + $0xf8] sm:$0xf0] }
  0x36   :  { %401 = vmatpush.bf16.msra.mxu2 %v1188_v10  ;;  %v1420_v44 = vor.u32 %v1680_v42, %v1419_v41  ;;  %v1411_v46 = vld [vmem:[#allocation10 + $0xe0] sm:$0xf]  ;;  %v1678_v47 = vld [vmem:[#allocation10 + $0xe4] sm:$0xf0]  ;;  %v1424_v48 = vor.u32 %v1679_v43, %v1421_v45  ;;  %v1677_v49 = vld [vmem:[#allocation10 + $0xe4] sm:$0xf] }
  0x37   :  { %414 = vmatpush.bf16.msra.mxu3 %v1252_v11  ;;  %v1413_v50 = vld [vmem:[#allocation10 + $0xe8] sm:$0xf0]  ;;  %v1355_v51 = vld [vmem:[#allocation10 + $0x70] sm:$0xf]  ;;  %v1412_v52 = vor.u32 %v1678_v47, %v1411_v46  ;;  %v1664_v53 = vld [vmem:[#allocation10 + $0x74] sm:$0xf0] }
  0x38   :  { %426 = vmatpush.bf16.msrb.mxu0 %v1200_v7  ;;  %439 = vmatpush.bf16.msrb.mxu1 %v1264_v8  ;;  %v1663_v54 = vld [vmem:[#allocation10 + $0x74] sm:$0xf]  ;;  %v1357_v55 = vld [vmem:[#allocation10 + $0x78] sm:$0xf0]  ;;  %v1416_v56 = vor.u32 %v1677_v49, %v1413_v50  ;;  %v1356_v57 = vor.u32 %v1664_v53, %v1355_v51  ;;  %v1403_v59 = vld [vmem:[#allocation10 + $0xd0] sm:$0xf] }
  0x39   :  { %v1360_v58 = vor.u32 %v1663_v54, %v1357_v55  ;;  %v1676_v60 = vld [vmem:[#allocation10 + $0xd4] sm:$0xf0]  ;;  %v1675_v61 = vld [vmem:[#allocation10 + $0xd4] sm:$0xf]  ;;  %v1405_v62 = vld [vmem:[#allocation10 + $0xd8] sm:$0xf0] }
  0x3a   :  { %402 = vmatpush.bf16.msra.mxu2 %v1180_v20  ;;  %v1347_v63 = vld [vmem:[#allocation10 + $0x60] sm:$0xf]  ;;  %v1662_v0 = vld [vmem:[#allocation10 + $0x64] sm:$0xf0]  ;;  %v1661_v2 = vld [vmem:[#allocation10 + $0x64] sm:$0xf]  ;;  %v1404_v4 = vor.u32 %v1676_v60, %v1403_v59  ;;  %v1408_v8 = vor.u32 %v1675_v61, %v1405_v62 }
  0x3b   :  { %415 = vmatpush.bf16.msra.mxu3 %v1244_v24  ;;  %v1348_v1 = vor.u32 %v1662_v0, %v1347_v63  ;;  %v1349_v3 = vld [vmem:[#allocation10 + $0x68] sm:$0xf0]  ;;  %v1395_v6 = vld [vmem:[#allocation10 + $0xc0] sm:$0xf]  ;;  %v1674_v7 = vld [vmem:[#allocation10 + $0xc4] sm:$0xf0] }
  0x3c   :  { %427 = vmatpush.bf16.msrb.mxu0 %v1192_v15  ;;  %440 = vmatpush.bf16.msrb.mxu1 %v1256_v16  ;;  %v1352_v5 = vor.u32 %v1661_v2, %v1349_v3  ;;  %v1339_v9 = vld [vmem:[#allocation10 + $0x50] sm:$0xf]  ;;  %v1660_v10 = vld [vmem:[#allocation10 + $0x54] sm:$0xf0]  ;;  %v1659_v11 = vld [vmem:[#allocation10 + $0x54] sm:$0xf]  ;;  %v1396_v18 = vor.u32 %v1674_v7, %v1395_v6 }
  0x3d   :  { %v1673_v12 = vld [vmem:[#allocation10 + $0xc4] sm:$0xf]  ;;  %v1397_v13 = vld [vmem:[#allocation10 + $0xc8] sm:$0xf0]  ;;  %v1341_v14 = vld [vmem:[#allocation10 + $0x58] sm:$0xf0]  ;;  %v1340_v15 = vor.u32 %v1660_v10, %v1339_v9 }
  0x3e   :  { %403 = vmatpush.bf16.msra.mxu2 %v1172_v32  ;;  %v1344_v16 = vor.u32 %v1659_v11, %v1341_v14  ;;  %v1331_v17 = vld [vmem:[#allocation10 + $0x40] sm:$0xf]  ;;  %v1658_v19 = vld [vmem:[#allocation10 + $0x44] sm:$0xf0]  ;;  %v1657_v20 = vld [vmem:[#allocation10 + $0x44] sm:$0xf]  ;;  %v1400_v22 = vor.u32 %v1673_v12, %v1397_v13 }
  0x3f   :  { %416 = vmatpush.bf16.msra.mxu3 %v1236_v36  ;;  %v1333_v21 = vld [vmem:[#allocation10 + $0x48] sm:$0xf0]  ;;  %v1387_v23 = vld [vmem:[#allocation10 + $0xb0] sm:$0xf]  ;;  %v1672_v24 = vld [vmem:[#allocation10 + $0xb4] sm:$0xf0]  ;;  %v1332_v27 = vor.u32 %v1658_v19, %v1331_v17 }
  0x40   :  { %428 = vmatpush.bf16.msrb.mxu0 %v1184_v25  ;;  %441 = vmatpush.bf16.msrb.mxu1 %v1248_v28  ;;  %v1671_v25 = vld [vmem:[#allocation10 + $0xb4] sm:$0xf]  ;;  %v1389_v26 = vld [vmem:[#allocation10 + $0xb8] sm:$0xf0]  ;;  %v1336_v28 = vor.u32 %v1657_v20, %v1333_v21  ;;  %v1388_v29 = vor.u32 %v1672_v24, %v1387_v23  ;;  %v1379_v31 = vld [vmem:[#allocation10 + $0xa0] sm:$0xf] }
  0x41   :  { %v1392_v30 = vor.u32 %v1671_v25, %v1389_v26  ;;  %v1670_v32 = vld [vmem:[#allocation10 + $0xa4] sm:$0xf0]  ;;  %v1669_v33 = vld [vmem:[#allocation10 + $0xa4] sm:$0xf]  ;;  %v1381_v34 = vld [vmem:[#allocation10 + $0xa8] sm:$0xf0] }
  0x42   :  { %650 = vmatpush.bf16.msrb.mxu2 %v1356_v57  ;;  %v146_v35 = vld [vmem:[#allocation7] sm:$0x3]  ;;  %v1380_v36 = vor.u32 %v1670_v32, %v1379_v31  ;;  %v1323_v50 = vld [vmem:[#allocation10 + $0x30] sm:$0xf]  ;;  %v1656_v51 = vld [vmem:[#allocation10 + $0x34] sm:$0xf0] }
  0x43   :  { %663 = vmatpush.bf16.msrb.mxu3 %v1420_v44  ;;  %v148_v38 = vperm.slane %v146_v35, 0  ;;  %v149_v39 = vperm.slane %v146_v35, 1  ;;  %v1324_v53 = vor.u32 %v1656_v51, %v1323_v50  ;;  %v1325_v54 = vld [vmem:[#allocation10 + $0x38] sm:$0xf0]  ;;  %v1668_v57 = vld [vmem:[#allocation10 + $0x94] sm:$0xf0] }
  0x44   :  { %429 = vmatpush.bf16.msrb.mxu0 %v1176_v37  ;;  %442 = vmatpush.bf16.msrb.mxu1 %v1240_v40  ;;  %v1384_v37 = vor.u32 %v1669_v33, %v1381_v34  ;;  %v1373_v60 = vld [vmem:[#allocation10 + $0x98] sm:$0xf0]  ;;  %v1315_v62 = vld [vmem:[#allocation10 + $0x20] sm:$0xf]  ;;  %v1654_v63 = vld [vmem:[#allocation10 + $0x24] sm:$0xf0] }
  0x45   :  { %v1653_v0 = vld [vmem:[#allocation10 + $0x24] sm:$0xf]  ;;  %v1317_v2 = vld [vmem:[#allocation10 + $0x28] sm:$0xf0]  ;;  %v1307_v10 = vld [vmem:[#allocation10 + $0x10] sm:$0xf] }
  0x46   :  { %651 = vmatpush.bf16.msrb.mxu2 %v1348_v1  ;;  %v1316_v1 = vor.u32 %v1654_v63, %v1315_v62  ;;  %v1320_v3 = vor.u32 %v1653_v0, %v1317_v2  ;;  %v1665_v6 = vld [vmem:[#allocation10 + $0x84] sm:$0xf]  ;;  %v1652_v11 = vld [vmem:[#allocation10 + $0x14] sm:$0xf0]  ;;  %v1651_v13 = vld [vmem:[#allocation10 + $0x14] sm:$0xf] }
  0x47   :  { %664 = vmatpush.bf16.msrb.mxu3 %v1412_v52  ;;  %v1655_v52 = vld [vmem:[#allocation10 + $0x34] sm:$0xf]  ;;  %v1308_v12 = vor.u32 %v1652_v11, %v1307_v10  ;;  %v1309_v14 = vld [vmem:[#allocation10 + $0x18] sm:$0xf0]  ;;  %v1650_v17 = vld [vmem:[#allocation10 + $0x4] sm:$0xf0] }
  0x48   :  { %689 = vmatpush.bf16.msra.mxu1 %v1424_v48  ;;  %676 = vmatpush.bf16.msra.mxu0 %v1360_v58  ;;  %v1328_v55 = vor.u32 %v1655_v52, %v1325_v54  ;;  %v1667_v58 = vld [vmem:[#allocation10 + $0x94] sm:$0xf]  ;;  %v1301_v20 = vld [vmem:[#allocation10 + $0x8] sm:$0xf0]  ;;  %v1712_v23 = vld [vmem:[#allocation11 + $0xf4] sm:$0xf0] }
  0x49   :  { %v1376_v61 = vor.u32 %v1667_v58, %v1373_v60  ;;  %v1711_v24 = vld [vmem:[#allocation11 + $0xf4] sm:$0xf]  ;;  %v1549_v26 = vld [vmem:[#allocation11 + $0xf8] sm:$0xf0]  ;;  %v1541_v31 = vld [vmem:[#allocation11 + $0xe8] sm:$0xf0] }
  0x4a   :  { %652 = vmatpush.bf16.msrb.mxu2 %v1340_v15  ;;  %v1312_v15 = vor.u32 %v1651_v13, %v1309_v14  ;;  %v1483_v32 = vld [vmem:[#allocation11 + $0x70] sm:$0xf]  ;;  %v1696_v34 = vld [vmem:[#allocation11 + $0x74] sm:$0xf0]  ;;  %v1695_v35 = vld [vmem:[#allocation11 + $0x74] sm:$0xf] }
  0x4b   :  { %665 = vmatpush.bf16.msrb.mxu3 %v1404_v4  ;;  %v1363_v4 = vld [vmem:[#allocation10 + $0x80] sm:$0xf]  ;;  %v1706_v52 = vld [vmem:[#allocation11 + $0xc4] sm:$0xf0]  ;;  %v1467_v54 = vld [vmem:[#allocation11 + $0x50] sm:$0xf] }
  0x4c   :  { %690 = vmatpush.bf16.msra.mxu1 %v1416_v56  ;;  %677 = vmatpush.bf16.msra.mxu0 %v1352_v5  ;;  %v1371_v56 = vld [vmem:[#allocation10 + $0x90] sm:$0xf]  ;;  %v1666_v5 = vld [vmem:[#allocation10 + $0x84] sm:$0xf0]  ;;  %v1523_v51 = vld [vmem:[#allocation11 + $0xc0] sm:$0xf] }
  0x4d   :  { %v1372_v59 = vor.u32 %v1668_v57, %v1371_v56  ;;  %v1364_v7 = vor.u32 %v1666_v5, %v1363_v4  ;;  %v1691_v56 = vld [vmem:[#allocation11 + $0x54] sm:$0xf]  ;;  %v1705_v57 = vld [vmem:[#allocation11 + $0xc4] sm:$0xf]  ;;  %v1525_v58 = vld [vmem:[#allocation11 + $0xc8] sm:$0xf0]  ;;  %v1524_v62 = vor.u32 %v1706_v52, %v1523_v51 }
  0x4e   :  { %653 = vmatpush.bf16.msrb.mxu2 %v1332_v27  ;;  %v1539_v27 = vld [vmem:[#allocation11 + $0xe0] sm:$0xf]  ;;  %v230_v63 = vld [vmem:[%s2073_s4] sm:$0x3]  ;;  %v1528_v0 = vor.u32 %v1705_v57, %v1525_v58  ;;  %v1685_v51 = vld [vmem:[#allocation11 + $0x24] sm:$0xf] }
  0x4f   :  { %666 = vmatpush.bf16.msrb.mxu3 %v1396_v18  ;;  %v1649_v18 = vld [vmem:[#allocation10 + $0x4] sm:$0xf]  ;;  %v232_v5 = vperm.slane %v230_v63, 0  ;;  %s1154_s17 = sshll.u32 %s2080_s11, 4  ;;  %s1155_s17 = int_to_ptr.hbm [resolvable:$true] %s1154_s17 }
  0x50   :  { %691 = vmatpush.bf16.msra.mxu1 %v1408_v8  ;;  %678 = vmatpush.bf16.msra.mxu0 %v1344_v16  ;;  %v1365_v8 = vld [vmem:[#allocation10 + $0x88] sm:$0xf0]  ;;  %v1299_v16 = vld [vmem:[#allocation10] sm:$0xf]  ;;  %v1304_v21 = vor.u32 %v1649_v18, %v1301_v20  ;;  %v1704_v20 = vld [vmem:[#allocation11 + $0xb4] sm:$0xf0] }
  0x51   :  { %v1368_v9 = vor.u32 %v1665_v6, %v1365_v8  ;;  %v1300_v19 = vor.u32 %v1650_v17, %v1299_v16  ;;  %v1697_v57 = vld [vmem:[#allocation11 + $0x84] sm:$0xf] }
  0x52   :  { %654 = vmatpush.bf16.msrb.mxu2 %v1324_v53 }
  0x53   :  { %667 = vmatpush.bf16.msrb.mxu3 %v1388_v29  ;;  %v1552_v29 = vor.u32 %v1711_v24, %v1549_v26  ;;  %v1690_v26 = vld [vmem:[#allocation11 + $0x44] sm:$0xf0] }
  0x54   :  { %692 = vmatpush.bf16.msra.mxu1 %v1400_v22  ;;  %679 = vmatpush.bf16.msra.mxu0 %v1336_v28  ;;  %v1547_v22 = vld [vmem:[#allocation11 + $0xf0] sm:$0xf]  ;;  %v1710_v28 = vld [vmem:[#allocation11 + $0xe4] sm:$0xf0] }
  0x55   :  { %v1548_v25 = vor.u32 %v1712_v23, %v1547_v22  ;;  %v1540_v33 = vor.u32 %v1710_v28, %v1539_v27  ;;  %v1517_v23 = vld [vmem:[#allocation11 + $0xb8] sm:$0xf0]  ;;  %v1689_v27 = vld [vmem:[#allocation11 + $0x44] sm:$0xf] }
  0x56   :  { %655 = vmatpush.bf16.msrb.mxu2 %v1316_v1  ;;  %v233_v1 = vperm.slane %v230_v63, 1 }
  0x57   :  { %668 = vmatpush.bf16.msrb.mxu3 %v1380_v36  ;;  %v1485_v36 = vld [vmem:[#allocation11 + $0x78] sm:$0xf0] }
  0x58   :  { %693 = vmatpush.bf16.msra.mxu1 %v1392_v30  ;;  %680 = vmatpush.bf16.msra.mxu0 %v1328_v55  ;;  %v1709_v30 = vld [vmem:[#allocation11 + $0xe4] sm:$0xf]  ;;  %v1692_v55 = vld [vmem:[#allocation11 + $0x54] sm:$0xf0] }
  0x59   :  { %v1468_v60 = vor.u32 %v1692_v55, %v1467_v54  ;;  %v1491_v55 = vld [vmem:[#allocation11 + $0x80] sm:$0xf] }
  0x5a   :  { %656 = vmatpush.bf16.msrb.mxu2 %v1308_v12 }
  0x5b   :  { %669 = vmatpush.bf16.msrb.mxu3 %v1372_v59  ;;  %v1469_v59 = vld [vmem:[#allocation11 + $0x58] sm:$0xf0] }
  0x5c   :  { %694 = vmatpush.bf16.msra.mxu1 %v1384_v37  ;;  %681 = vmatpush.bf16.msra.mxu0 %v1320_v3  ;;  %v1544_v37 = vor.u32 %v1709_v30, %v1541_v31  ;;  %v1507_v30 = vld [vmem:[#allocation11 + $0xa0] sm:$0xf]  ;;  %v1702_v31 = vld [vmem:[#allocation11 + $0xa4] sm:$0xf0] }
  0x5e   :  { %657 = vmatpush.bf16.msrb.mxu2 %v1300_v19  ;;  %v1515_v19 = vld [vmem:[#allocation11 + $0xb0] sm:$0xf] }
  0x5f   :  { %670 = vmatpush.bf16.msrb.mxu3 %v1364_v7  ;;  %v1516_v22 = vor.u32 %v1704_v20, %v1515_v19 }
  0x60   :  { %695 = vmatpush.bf16.msra.mxu1 %v1376_v61  ;;  %682 = vmatpush.bf16.msra.mxu0 %v1312_v15  ;;  %v1472_v61 = vor.u32 %v1691_v56, %v1469_v59  ;;  %v1698_v56 = vld [vmem:[#allocation11 + $0x84] sm:$0xf0]  ;;  %v1493_v59 = vld [vmem:[#allocation11 + $0x88] sm:$0xf0] }
  0x61   :  { %v1492_v58 = vor.u32 %v1698_v56, %v1491_v55 }
  0x64   :  { %696 = vmatpush.bf16.msra.mxu1 %v1368_v9  ;;  %683 = vmatpush.bf16.msra.mxu0 %v1304_v21  ;;  %v1703_v21 = vld [vmem:[#allocation11 + $0xb4] sm:$0xf] }
  0x65   :  { %v1520_v24 = vor.u32 %v1703_v21, %v1517_v23 }
  0xa4   :  { %v177_v40 = vpop.f32.mrf.mxu0 }
  0xa5   :  { %v178_v42 = vadd.f32 %v177_v40, %v148_v38  ;;  %v1484_v38 = vor.u32 %v1696_v34, %v1483_v32  ;;  %v1531_v40 = vld [vmem:[#allocation11 + $0xd0] sm:$0xf]  ;;  %v1701_v34 = vld [vmem:[#allocation11 + $0xa4] sm:$0xf] }
  0xa6   :  { %v190_v41 = vpop.f32.mrf.mxu1 }
  0xa7   :  { %v191_v43 = vadd.f32 %v190_v41, %v149_v39  ;;  %v194_v44 = vmax.f32 %v178_v42, 0.0  ;;  %v1488_v39 = vor.u32 %v1695_v35, %v1485_v36  ;;  %v1708_v41 = vld [vmem:[#allocation11 + $0xd4] sm:$0xf0]  ;;  %v1707_v42 = vld [vmem:[#allocation11 + $0xd4] sm:$0xf] }
  0xa8   :  { %v1509_v35 = vld [vmem:[#allocation11 + $0xa8] sm:$0xf0] }
  0xa9   :  { %v195_v45 = vmax.f32 %v191_v43, 0.0  ;;  %v196_v46 = vpack.c.bf16 %v194_v44, %v194_v44  ;;  %v1533_v43 = vld [vmem:[#allocation11 + $0xd8] sm:$0xf0]  ;;  %v1475_v44 = vld [vmem:[#allocation11 + $0x60] sm:$0xf]  ;;  %v1512_v36 = vor.u32 %v1701_v34, %v1509_v35 }
  0xaa   :  { %v1536_v53 = vor.u32 %v1707_v42, %v1533_v43  ;;  %v1499_v43 = vld [vmem:[#allocation11 + $0x90] sm:$0xf]  ;;  %v1724_v35 = vld [vmem:[#allocation13 + $0x58] sm:$0xff] }
  0xab   :  { %v197_v47 = vpack.c.bf16 %v195_v45, %v195_v45  ;;  %404 = vmatmul.bf16.vlgmr.msra.gmra.mxu2 %v196_v46  ;;  %430 = vmatmul.bf16.vlgmr.msrb.gmra.mxu0 %v196_v46  ;;  %v1694_v45 = vld [vmem:[#allocation11 + $0x64] sm:$0xf0] }
  0xac   :  { %v179_v48 = vpop.f32.mrf.mxu0  ;;  %904 = vmatpush.bf16.msra.mxu2 %v1484_v38  ;;  %930 = vmatpush.bf16.msrb.mxu0 %v1488_v39  ;;  %v1476_v46 = vor.u32 %v1694_v45, %v1475_v44  ;;  %v1688_v38 = vld [vmem:[#allocation11 + $0x34] sm:$0xf0]  ;;  %v1687_v39 = vld [vmem:[#allocation11 + $0x34] sm:$0xf] }
  0xad   :  { %417 = vmatmul.bf16.vlgmr.msra.gmra.mxu3 %v197_v47  ;;  %443 = vmatmul.bf16.vlgmr.msrb.gmra.mxu1 %v197_v47  ;;  %v1693_v47 = vld [vmem:[#allocation11 + $0x64] sm:$0xf]  ;;  %v1477_v48 = vld [vmem:[#allocation11 + $0x68] sm:$0xf0]  ;;  %v1700_v44 = vld [vmem:[#allocation11 + $0x94] sm:$0xf0] }
  0xae   :  { %v192_v49 = vpop.f32.mrf.mxu1  ;;  %917 = vmatpush.bf16.msra.mxu3 %v1548_v25  ;;  %943 = vmatpush.bf16.msrb.mxu1 %v1552_v29  ;;  %v1480_v50 = vor.u32 %v1693_v47, %v1477_v48  ;;  %v1459_v25 = vld [vmem:[#allocation11 + $0x40] sm:$0xf]  ;;  %v1461_v29 = vld [vmem:[#allocation11 + $0x48] sm:$0xf0]  ;;  %v1500_v45 = vor.u32 %v1700_v44, %v1499_v43  ;;  %v1501_v47 = vld [vmem:[#allocation11 + $0x98] sm:$0xf0] }
  0xaf   :  { %v1532_v49 = vor.u32 %v1708_v41, %v1531_v40  ;;  %v1460_v28 = vor.u32 %v1690_v26, %v1459_v25  ;;  %v1464_v32 = vor.u32 %v1689_v27, %v1461_v29  ;;  %v1453_v41 = vld [vmem:[#allocation11 + $0x38] sm:$0xf0]  ;;  %v1713_v43 = vld [vmem:[#allocation13] sm:$0xff] }
  0xb0   :  { %905 = vmatpush.bf16.msra.mxu2 %v1476_v46  ;;  %931 = vmatpush.bf16.msrb.mxu0 %v1480_v50  ;;  %v1456_v42 = vor.u32 %v1687_v39, %v1453_v41  ;;  %v1699_v46 = vld [vmem:[#allocation11 + $0x94] sm:$0xf]  ;;  %v1686_v50 = vld [vmem:[#allocation11 + $0x24] sm:$0xf0]  ;;  %v1721_v41 = vld [vmem:[#allocation13 + $0x40] sm:$0xff] }
  0xb1   :  { %v1504_v48 = vor.u32 %v1699_v46, %v1501_v47  ;;  %v1722_v39 = vld [vmem:[#allocation13 + $0x48] sm:$0xff] }
  0xb2   :  { %918 = vmatpush.bf16.msra.mxu3 %v1540_v33  ;;  %944 = vmatpush.bf16.msrb.mxu1 %v1544_v37  ;;  %v1508_v33 = vor.u32 %v1702_v31, %v1507_v30  ;;  %v1451_v37 = vld [vmem:[#allocation11 + $0x30] sm:$0xf] }
  0xb3   :  { %v1452_v40 = vor.u32 %v1688_v38, %v1451_v37  ;;  %v1723_v37 = vld [vmem:[#allocation13 + $0x50] sm:$0xff]  ;;  %v1716_v38 = vld [vmem:[#allocation13 + $0x18] sm:$0xff] }
  0xb4   :  { %906 = vmatpush.bf16.msra.mxu2 %v1468_v60  ;;  %932 = vmatpush.bf16.msrb.mxu0 %v1472_v61  ;;  %v1496_v60 = vor.u32 %v1697_v57, %v1493_v59  ;;  %v1435_v61 = vld [vmem:[#allocation11 + $0x10] sm:$0xf] }
  0xb6   :  { %919 = vmatpush.bf16.msra.mxu3 %v1532_v49  ;;  %945 = vmatpush.bf16.msrb.mxu1 %v1536_v53  ;;  %v1443_v49 = vld [vmem:[#allocation11 + $0x20] sm:$0xf]  ;;  %v1445_v53 = vld [vmem:[#allocation11 + $0x28] sm:$0xf0] }
  0xb7   :  { %v1444_v52 = vor.u32 %v1686_v50, %v1443_v49  ;;  %v1448_v54 = vor.u32 %v1685_v51, %v1445_v53 }
  0xb8   :  { %907 = vmatpush.bf16.msra.mxu2 %v1460_v28  ;;  %933 = vmatpush.bf16.msrb.mxu0 %v1464_v32 }
  0xba   :  { %920 = vmatpush.bf16.msra.mxu3 %v1524_v62  ;;  %946 = vmatpush.bf16.msrb.mxu1 %v1528_v0  ;;  %v1684_v62 = vld [vmem:[#allocation11 + $0x14] sm:$0xf0]  ;;  %v1683_v0 = vld [vmem:[#allocation11 + $0x14] sm:$0xf] }
  0xbb   :  { %v1436_v63 = vor.u32 %v1684_v62, %v1435_v61 }
  0xbc   :  { %908 = vmatpush.bf16.msra.mxu2 %v1452_v40  ;;  %934 = vmatpush.bf16.msrb.mxu0 %v1456_v42  ;;  %v1715_v40 = vld [vmem:[#allocation13 + $0x10] sm:$0xff]  ;;  %v1714_v42 = vld [vmem:[#allocation13 + $0x8] sm:$0xff] }
  0xbe   :  { %921 = vmatpush.bf16.msra.mxu3 %v1516_v22  ;;  %947 = vmatpush.bf16.msrb.mxu1 %v1520_v24 }
  0xc0   :  { %909 = vmatpush.bf16.msra.mxu2 %v1444_v52  ;;  %935 = vmatpush.bf16.msrb.mxu0 %v1448_v54 }
  0xc2   :  { %922 = vmatpush.bf16.msra.mxu3 %v1508_v33  ;;  %948 = vmatpush.bf16.msrb.mxu1 %v1512_v36  ;;  %v1717_v36 = vld [vmem:[#allocation13 + $0x20] sm:$0xff] }
  0xc4   :  { %910 = vmatpush.bf16.msra.mxu2 %v1436_v63 }
  0xc6   :  { %923 = vmatpush.bf16.msra.mxu3 %v1500_v45  ;;  %949 = vmatpush.bf16.msrb.mxu1 %v1504_v48  ;;  %v738_v45 = vld [vmem:[%s2077_s8] sm:$0x3] }
  0xc7   :  { %v741_v46 = vperm.slane %v738_v45, 1  ;;  %v740_v52 = vperm.slane %v738_v45, 0 }
  0xca   :  { %924 = vmatpush.bf16.msra.mxu3 %v1492_v58  ;;  %950 = vmatpush.bf16.msrb.mxu1 %v1496_v60 }
 0x128   :  { %v431_v2 = vpop.f32.mrf.mxu0 }
 0x129   :  { %v432_v4 = vadd.f32 %v431_v2, %v233_v1  ;;  %v1437_v1 = vld [vmem:[#allocation11 + $0x18] sm:$0xf0] }
 0x12a   :  { %v444_v3 = vpop.f32.mrf.mxu1  ;;  %v1440_v2 = vor.u32 %v1683_v0, %v1437_v1  ;;  %v1118_v0 = vlaneseq  ;;  %v1741_v1 = vld [vmem:[%s2079_s10] ss:$0 sm:$0xff]  ;;  %s1959_s10 = smov [#allocation14]  }
 0x12b   :  { %v445_v6 = vadd.f32 %v444_v3, %v432_v4  ;;  %v1427_v3 = vld [vmem:[#allocation11] sm:$0xf]  ;;  %v1682_v4 = vld [vmem:[#allocation11 + $0x4] sm:$0xf0]  ;;  %s1152_s14 = sshll.u32 %s1959_s10, 4  ;;  %s1153_s14 = int_to_ptr.vmem [resolvable:$true] %s1152_s14 }
 0x12c   :  { %936 = vmatpush.bf16.msrb.mxu0 %v1440_v2  ;;  %v1119_v2 = vand.u32 127, %v1118_v0 }
 0x12d   :  { %v449_v7 = vmax.f32 %v445_v6, 0.0  ;;  %v1428_v6 = vor.u32 %v1682_v4, %v1427_v3 }
 0x12e   :  { %v405_v8 = vpop.f32.mrf.mxu2  ;;  %vm1120_vm2 = vcmp.lt.s32.totalorder %v1119_v2, 4  ;;  %vm1144_vm7 = vcmp.eq.s32.totalorder %v1119_v2, 4 }
 0x12f   :  { %v406_v10 = vadd.f32 %v405_v8, %v232_v5  ;;  %v451_v11 = vpack.c.bf16 %v449_v7, %v449_v7  ;;  %v1681_v5 = vld [vmem:[#allocation11 + $0x4] sm:$0xf]  ;;  %v1429_v7 = vld [vmem:[#allocation11 + $0x8] sm:$0xf0]  ;;  %911 = vmatpush.bf16.msra.mxu2 %v1428_v6 }
 0x130   :  { %v418_v9 = vpop.f32.mrf.mxu3  ;;  %v433_v13 = vpop.f32.mrf.mxu0  ;;  %v1432_v8 = vor.u32 %v1681_v5, %v1429_v7 }
 0x131   :  { %v419_v12 = vadd.f32 %v418_v9, %v406_v10  ;;  %671 = vmatmul.bf16.vlgmr.msrb.gmra.mxu3 %v451_v11  ;;  %697 = vmatmul.bf16.vlgmr.msra.gmra.mxu1 %v451_v11  ;;  %v1728_v9 = vld [vmem:[#allocation13 + $0x78] sm:$0xff]  ;;  %v1727_v11 = vld [vmem:[#allocation13 + $0x70] sm:$0xff]  ;;  %v1726_v13 = vld [vmem:[#allocation13 + $0x68] sm:$0xff] }
 0x132   :  { %v446_v14 = vpop.f32.mrf.mxu1  ;;  %937 = vmatpush.bf16.msrb.mxu0 %v1432_v8  ;;  %v1720_v10 = vld [vmem:[#allocation13 + $0x38] sm:$0xff]  ;;  %1105 = vmatpush.bf16.msrb.mxu3 %v1728_v9 }
 0x133   :  { %v448_v15 = vmax.f32 %v419_v12, 0.0  ;;  %v1719_v12 = vld [vmem:[#allocation13 + $0x30] sm:$0xff]  ;;  %v1718_v14 = vld [vmem:[#allocation13 + $0x28] sm:$0xff] }
 0x135   :  { %v450_v16 = vpack.c.bf16 %v448_v15, %v448_v15  ;;  %v1725_v15 = vld [vmem:[#allocation13 + $0x60] sm:$0xff] }
 0x136   :  { %v407_v17 = vpop.f32.mrf.mxu2  ;;  %1106 = vmatpush.bf16.msrb.mxu3 %v1727_v11 }
 0x137   :  { %658 = vmatmul.bf16.vlgmr.msrb.gmra.mxu2 %v450_v16  ;;  %684 = vmatmul.bf16.vlgmr.msra.gmra.mxu0 %v450_v16  ;;  %v484_v16 = vld [vmem:[%s2075_s6] sm:$0x3] }
 0x138   :  { %v420_v18 = vpop.f32.mrf.mxu3  ;;  %1092 = vmatpush.bf16.msrb.mxu2 %v1720_v10  ;;  %v486_v24 = vperm.slane %v484_v16, 0 }
 0x139   :  { %v487_v18 = vperm.slane %v484_v16, 1 }
 0x13a   :  { %1107 = vmatpush.bf16.msrb.mxu3 %v1726_v13 }
 0x13c   :  { %1093 = vmatpush.bf16.msrb.mxu2 %v1719_v12 }
 0x13e   :  { %1108 = vmatpush.bf16.msrb.mxu3 %v1725_v15 }
 0x140   :  { %1094 = vmatpush.bf16.msrb.mxu2 %v1718_v14 }
 0x142   :  { %1109 = vmatpush.bf16.msrb.mxu3 %v1724_v35 }
 0x144   :  { %1095 = vmatpush.bf16.msrb.mxu2 %v1717_v36 }
 0x146   :  { %1110 = vmatpush.bf16.msrb.mxu3 %v1723_v37 }
 0x148   :  { %1096 = vmatpush.bf16.msrb.mxu2 %v1716_v38 }
 0x14a   :  { %1111 = vmatpush.bf16.msrb.mxu3 %v1722_v39 }
 0x14c   :  { %1097 = vmatpush.bf16.msrb.mxu2 %v1715_v40 }
 0x14e   :  { %1112 = vmatpush.bf16.msrb.mxu3 %v1721_v41 }
 0x150   :  { %1098 = vmatpush.bf16.msrb.mxu2 %v1714_v42 }
 0x154   :  { %1099 = vmatpush.bf16.msrb.mxu2 %v1713_v43 }
 0x1ae   :  { %v698_v17 = vpop.f32.mrf.mxu1 }
 0x1b4   :  { %v685_v19 = vpop.f32.mrf.mxu0  ;;  %v672_v20 = vpop.f32.mrf.mxu3 }
 0x1b5   :  { %v686_v21 = vadd.f32 %v685_v19, %v487_v18 }
 0x1b6   :  { %v700_v23 = vpop.f32.mrf.mxu1 }
 0x1b7   :  { %v699_v22 = vadd.f32 %v698_v17, %v686_v21 }
 0x1b9   :  { %v703_v25 = vmax.f32 %v699_v22, 0.0 }
 0x1ba   :  { %v659_v26 = vpop.f32.mrf.mxu2 }
 0x1bb   :  { %v705_v27 = vpack.c.bf16 %v703_v25, %v703_v25  ;;  %v660_v28 = vadd.f32 %v659_v26, %v486_v24 }
 0x1bc   :  { %v687_v29 = vpop.f32.mrf.mxu0  ;;  %v674_v31 = vpop.f32.mrf.mxu3 }
 0x1bd   :  { %v673_v30 = vadd.f32 %v672_v20, %v660_v28  ;;  %925 = vmatmul.bf16.vlgmr.msra.gmra.mxu3 %v705_v27  ;;  %951 = vmatmul.bf16.vlgmr.msrb.gmra.mxu1 %v705_v27 }
 0x1bf   :  { %v702_v32 = vmax.f32 %v673_v30, 0.0 }
 0x1c1   :  { %v704_v33 = vpack.c.bf16 %v702_v32, %v702_v32 }
 0x1c2   :  { %v661_v34 = vpop.f32.mrf.mxu2 }
 0x1c3   :  { %912 = vmatmul.bf16.vlgmr.msra.gmra.mxu2 %v704_v33  ;;  %938 = vmatmul.bf16.vlgmr.msrb.gmra.mxu0 %v704_v33 }
 0x23a   :  { %v952_v44 = vpop.f32.mrf.mxu1 }
 0x240   :  { %v926_v47 = vpop.f32.mrf.mxu3  ;;  %v939_v48 = vpop.f32.mrf.mxu0 }
 0x241   :  { %v940_v49 = vadd.f32 %v939_v48, %v741_v46 }
 0x242   :  { %v954_v50 = vpop.f32.mrf.mxu1 }
 0x243   :  { %v953_v51 = vadd.f32 %v952_v44, %v940_v49 }
 0x245   :  { %v957_v53 = vmax.f32 %v953_v51, 0.0 }
 0x246   :  { %v913_v54 = vpop.f32.mrf.mxu2 }
 0x247   :  { %v959_v55 = vpack.c.bf16 %v957_v53, %v957_v53  ;;  %v914_v56 = vadd.f32 %v913_v54, %v740_v52 }
 0x248   :  { %v928_v57 = vpop.f32.mrf.mxu3  ;;  %v941_v58 = vpop.f32.mrf.mxu0 }
 0x249   :  { %v927_v59 = vadd.f32 %v926_v47, %v914_v56  ;;  %1113 = vmatmul.bf16.vlgmr.msrb.gmra.mxu3 %v959_v55 }
 0x24b   :  { %v956_v60 = vmax.f32 %v927_v59, 0.0 }
 0x24d   :  { %v958_v61 = vpack.c.bf16 %v956_v60, %v956_v60 }
 0x24e   :  { %v915_v62 = vpop.f32.mrf.mxu2 }
 0x24f   :  { %1100 = vmatmul.bf16.vlgmr.msrb.gmra.mxu2 %v958_v61 }
 0x2cc   :  { %v1114_v63 = vpop.f32.mrf.mxu3 }
 0x2d2   :  { %v1101_v3 = vpop.f32.mrf.mxu2 }
 0x2d3   :  { %v1102_v4 = vadd.f32 %v1741_v1, %v1101_v3 }
 0x2d4   :  { %v1116_v5 = vpop.f32.mrf.mxu3 }
 0x2d5   :  { %v1115_v6 = vadd.f32 %v1114_v63, %v1102_v4 }
 0x2d7   :  { %v1121_v7 = vsel %vm1120_vm2, %v1115_v6, -inf }
 0x2d8   :  { %1122 = vmax.xlane.f32.xlu0 %v1121_v7 }
 0x2da   :  { %v1103_v8 = vpop.f32.mrf.mxu2 }
 0x34b   :  { %v1123_v9 = vpop.xlane.xlu0 %1122 }
 0x34c   :  { %v1124_v10 = vsub.f32 %v1121_v7, %v1123_v9 }
 0x34e   :  { %v1125_v11 = vmul.f32 1.442695, %v1124_v10 }
 0x350   :  { %1742 = vpow2.f32 %v1125_v11 }
 0x356   :  { %v1743_v12 = vpop.eup %1742 }
 0x357   :  { %1127 = vadd.xlane.f32.xlu0 %v1743_v12 }
 0x3ca   :  { %v1128_v13 = vpop.xlane.xlu0 %1127 }
 0x3cb   :  { %1744 = vrcp.f32 %v1128_v13  ;;  %v1140_v17 = vand.u32 2147483648, %v1128_v13  ;;  %v1138_v19 = vand.u32 2147483647, %v1128_v13  ;;  %vm1134_vm4 = vweird.f32 %v1128_v13 }
 0x3cd   :  { %v1141_v21 = vor.u32 1.1754944e-38, %v1140_v17  ;;  %vm1139_vm6 = vcmp.eq.f32.partialorder %v1138_v19, 8.507059e+37 }
 0x3d1   :  { %v1745_v14 = vpop.eup %1744 }
 0x3d2   :  { %v1130_v15 = vmul.f32 %v1745_v14, %v1128_v13  ;;  %vm1135_vm3 = vweird.f32 %v1745_v14 }
 0x3d3   :  { %vm1136_vm5 = vmor %vm1134_vm4, %vm1135_vm3 }
 0x3d4   :  { %v1131_v16 = vsub.f32 1.0, %v1130_v15 }
 0x3d6   :  { %v1132_v18 = vmul.f32 %v1745_v14, %v1131_v16 }
 0x3d8   :  { %v1133_v20 = vadd.f32 %v1745_v14, %v1132_v18 }
 0x3da   :  { %v1137_v22 = vsel %vm1136_vm5, %v1745_v14, %v1133_v20 }
 0x3db   :  { %v1142_v23 = vsel %vm1139_vm6, %v1141_v21, %v1137_v22 }
 0x3dc   :  { %v1143_v24 = vmul.f32 %v1743_v12, %v1142_v23 }
 0x3de   :  { %v1145_v25 = vsel %vm1144_vm7, %v1115_v6, %v1143_v24 }
 0x3df   :  { %1146 = vst [vmem:[#allocation14] sm:$0xff] %v1145_v25 }
 0x3e0   :  { %1157 = dma.vmem_to_hbm [thread:$0]  %s1153_s14, 128, %s1155_s17, [#allocation4]  }
 0x3e1   :  { %1946 = dma.done.wait [#allocation4], 128  }
 0x3e2   :  { %1947 = vsyncadd [#allocation4], 4294967168 }
 0x3e3   :  { %1162 = vsyncpa [#allocation3], 1 }
 0x3e4   :  { %1163 = vsyncpa [#allocation6], 1 }
 0x3e5   :  { %1164 = vsyncpa [#allocation9], 1 }
 0x3e6   :  { %1165 = vsyncpa [#allocation12], 1 }
 0x3e7   :  { %1166 = vsyncpa [#allocation4], 1 }

</bundles_post_ra>
